<compile_context>
chip_gen: v5e
topology: v5e:2x2
jax: 0.10.0
libtpu: 0.0.40
codegen_flags: <defaults>
</compile_context>

<pallas_src>
import jax
import jax.numpy as jnp
from jax.experimental import pallas as pl
from jax.experimental.pallas import tpu as pltpu


def _round_up(x: int, m: int) -> int:
    return ((x + m - 1) // m) * m


def _vmem_budget_bytes() -> int:
    """Conservative scoped-VMEM budget, generation aware when the API is available."""
    try:
        cap = int(pltpu.get_tpu_info().vmem_capacity_bytes)
    except Exception:  # older/newer API or CPU interpret -- fall back to v7x worst case
        cap = 64 * 1024 * 1024
    # Half of physical, capped at 48 MiB (v5e/v6e: 128 MiB physical -> 48 MiB,
    # v7x: 64 MiB physical -> 32 MiB).  Always >= every generation's scoped default.
    return min(cap // 2, 48 * 1024 * 1024)


def _mlp_decoder_kernel(x_ref, w1_ref, b1_ref, w2_ref, b2_ref, out_ref):
    # x: [TB, D] (orig dtype), w1: [D, Hp] bf16, b1: [1, Hp] f32,
    # w2: [Hp, Cp] bf16, b2: [1, Cp] f32, out: [TB, Cp] f32/bf16.
    x = x_ref[...].astype(jnp.bfloat16)           # in-kernel cast: no host-side x pre-pass
    h = jnp.dot(x, w1_ref[...], preferred_element_type=jnp.float32) + b1_ref[...]
    h = jnp.maximum(h, 0.0)                       # ReLU between the two Linear layers
    logits = jnp.dot(h.astype(jnp.bfloat16), w2_ref[...],
                     preferred_element_type=jnp.float32) + b2_ref[...]
    out_ref[...] = logits.astype(out_ref.dtype)   # lane-dense store (Cp % 128 == 0)


def prepare_mlp_decoder_params(w1, b1, w2, b2):
    """One-time pad/cast of MLPDecoder params.

    Call this at model-init time (NOT per forward): hidden/class dims are padded
    to 128 lanes (padded columns/rows are zero, so they contribute nothing),
    weights are cast to bf16, biases kept in f32.  Accepts biases of shape (H,)
    or (1, H) (torch checkpoints store 1-D biases).
    """
    D, H = w1.shape
    C = w2.shape[1]
    Hp = _round_up(H, 128)
    Cp = _round_up(C, 128)
    w1_p = jnp.zeros((D, Hp), jnp.bfloat16).at[:, :H].set(jnp.asarray(w1).astype(jnp.bfloat16))
    b1_p = jnp.zeros((1, Hp), jnp.float32).at[:, :H].set(
        jnp.asarray(b1, jnp.float32).reshape(1, H))
    w2_p = jnp.zeros((Hp, Cp), jnp.bfloat16).at[:H, :C].set(jnp.asarray(w2).astype(jnp.bfloat16))
    b2_p = jnp.zeros((1, Cp), jnp.float32).at[:, :C].set(
        jnp.asarray(b2, jnp.float32).reshape(1, C))
    return {"w1": w1_p, "b1": b1_p, "w2": w2_p, "b2": b2_p,
            "D": D, "H": H, "C": C, "Hp": Hp, "Cp": Cp}


def intent_doc_labelling_forward(x, params, *, out_dtype=jnp.float32, tb=None):
    """Pallas forward pass: logits = MLPDecoder(x)  (Linear -> ReLU -> Linear)."""
    B, D = x.shape
    assert D == params["D"], (D, params["D"])
    Hp, Cp, C = params["Hp"], params["Cp"], params["C"]

    x_itemsize = jnp.dtype(x.dtype).itemsize
    out_itemsize = jnp.dtype(out_dtype).itemsize
    # Sublane packing: 8 rows for 4-byte x, 16 for bf16, 32 for 1-byte types.
    sub = max(8, 32 // max(x_itemsize, 1))

    budget = _vmem_budget_bytes()
    if tb is None:
        # Largest tile that fits the budget (double-buffered x/out tiles +
        # double-buffered resident weights + f32 hidden temp), then shrink it to
        # ceil(B / n_steps) so batch padding never balloons (e.g. B=520 -> tb=520,
        # not Bp=1024).
        weight_bytes = 2 * (D * Hp * 2 + Hp * Cp * 2 + (Hp + Cp) * 4)
        per_row = 2 * D * x_itemsize + 2 * Cp * out_itemsize + Hp * 4
        avail = max(per_row * sub, budget - weight_bytes - (2 << 20))
        tb_max = max(sub, min(4096, (avail // per_row) // sub * sub))
        n_steps = pl.cdiv(B, tb_max)
        tb = _round_up(pl.cdiv(B, n_steps), sub)
    else:
        tb = _round_up(tb, sub)
    Bp = _round_up(B, tb)

    # Only pad the batch dim, and only when needed; feature dim stays unpadded
    # and x keeps its dtype (cast happens inside the kernel).
    x_in = x if Bp == B else jnp.pad(x, ((0, Bp - B), (0, 0)))

    grid = (Bp // tb,)
    cost = pl.CostEstimate(
        flops=2 * Bp * (D * Hp + Hp * Cp),
        transcendentals=0,
        bytes_accessed=(Bp * D * x_itemsize + D * Hp * 2 + Hp * Cp * 2
                        + (Hp + Cp) * 4 + Bp * Cp * out_itemsize),
    )

    out_p = pl.pallas_call(
        _mlp_decoder_kernel,
        out_shape=jax.ShapeDtypeStruct((Bp, Cp), out_dtype),
        grid=grid,
        in_specs=[
            pl.BlockSpec((tb, D), lambda i: (i, 0)),    # x tile, double-buffered
            pl.BlockSpec((D, Hp), lambda i: (0, 0)),    # w1 resident (constant index -> no re-DMA)
            pl.BlockSpec((1, Hp), lambda i: (0, 0)),    # b1 resident
            pl.BlockSpec((Hp, Cp), lambda i: (0, 0)),   # w2 resident
            pl.BlockSpec((1, Cp), lambda i: (0, 0)),    # b2 resident
        ],
        out_specs=pl.BlockSpec((tb, Cp), lambda i: (i, 0)),
        compiler_params=pltpu.CompilerParams(
            dimension_semantics=("parallel",),          # v7x: shard batch over 2 TCs when grid>=2
            vmem_limit_bytes=int(budget),               # explicit (v5e default is only 16 MiB)
        ),
        cost_estimate=cost,
    )(x_in, params["w1"], params["b1"], params["w2"], params["b2"])

    # Slice away batch padding and zero-logit pad classes before any softmax/argmax.
    return out_p[:B, :C]


def _init_linear(key, fan_in, fan_out):
    # Deterministic init mimicking torch.nn.Linear default (uniform +/- 1/sqrt(fan_in)).
    kw, kb = jax.random.split(key)
    bound = 1.0 / jnp.sqrt(jnp.float32(fan_in))
    w = jax.random.uniform(kw, (fan_in, fan_out), jnp.float32, -bound, bound)
    b = jax.random.uniform(kb, (fan_out,), jnp.float32, -bound, bound)  # 1-D, like torch
    return w, b


if __name__ == "__main__":
    key = jax.random.PRNGKey(0)
    k_x, k_l1, k_l2 = jax.random.split(key, 3)

    batch, in_dim, hidden_dim, n_classes = 8, 32, 64, 16

    # "inputs" to forward() are document representations [batch, in_dim]
    x = jax.random.normal(k_x, (batch, in_dim), jnp.float32)

    # MLPDecoder params: Linear(in_dim, hidden) -> ReLU -> Linear(hidden, n_classes)
    w1, b1 = _init_linear(k_l1, in_dim, hidden_dim)
    w2, b2 = _init_linear(k_l2, hidden_dim, n_classes)

    # Pad/cast once at init time (hoisted out of the per-call forward path).
    params = prepare_mlp_decoder_params(w1, b1, w2, b2)
    params = jax.block_until_ready(params)

    logits = intent_doc_labelling_forward(x, params)
    logits = jax.block_until_ready(logits)
    assert logits.shape == (batch, n_classes)

    # Pure-JAX reference matching the kernel's bf16-input / f32-accumulate path.
    xb = x.astype(jnp.bfloat16).astype(jnp.float32)
    w1b = w1.astype(jnp.bfloat16).astype(jnp.float32)
    w2b = w2.astype(jnp.bfloat16).astype(jnp.float32)
    h_ref = jnp.maximum(xb @ w1b + b1, 0.0)
    ref = h_ref.astype(jnp.bfloat16).astype(jnp.float32) @ w2b + b2
    assert jnp.allclose(logits, ref, atol=1e-2, rtol=1e-2), (
        float(jnp.max(jnp.abs(logits - ref))))

    # Also sanity-check against the full f32 reference (bf16 cast error only).
    ref_f32 = jnp.maximum(x @ w1 + b1, 0.0) @ w2 + b2
    assert jnp.allclose(logits, ref_f32, atol=5e-2, rtol=5e-2)

    # TODO(synk): encode()/get_results()/get_loss() (DocNN/RoBERTa encoder,
    # ClassificationHead softmax+argmax, loss) are not part of forward() and
    # are not implemented here.
    print("KERNEL_OK")
</pallas_src>

<mosaic_0001>
module attributes {stable_mosaic.version = 11 : i64} {
  func.func @_mlp_decoder_kernel(%arg0: i32, %arg1: memref<8x32xf32, #tpu.memory_space<vmem>>, %arg2: memref<32x128xbf16, #tpu.memory_space<vmem>>, %arg3: memref<1x128xf32, #tpu.memory_space<vmem>>, %arg4: memref<128x128xbf16, #tpu.memory_space<vmem>>, %arg5: memref<1x128xf32, #tpu.memory_space<vmem>>, %arg6: memref<8x128xf32, #tpu.memory_space<vmem>>) attributes {dimension_semantics = [#tpu.dimension_semantics<parallel>], iteration_bounds = array<i64: 1>, scalar_prefetch = 0 : i64, scratch_operands = 0 : i64, tpu.core_type = #tpu.core_type<tc>, window_params = [{transform_indices = @transform_0, window_bounds = array<i64: 8, 32>}, {pipeline_mode = #tpu.pipeline_mode<synchronous>, transform_indices = @transform_1, window_bounds = array<i64: 32, 128>}, {pipeline_mode = #tpu.pipeline_mode<synchronous>, transform_indices = @transform_2, window_bounds = array<i64: 1, 128>}, {pipeline_mode = #tpu.pipeline_mode<synchronous>, transform_indices = @transform_3, window_bounds = array<i64: 128, 128>}, {pipeline_mode = #tpu.pipeline_mode<synchronous>, transform_indices = @transform_4, window_bounds = array<i64: 1, 128>}, {transform_indices = @transform_5, window_bounds = array<i64: 8, 128>}]} {
    %c0 = arith.constant 0 : index
    %c0_0 = arith.constant 0 : index
    %0 = vector.load %arg1[%c0, %c0_0] : memref<8x32xf32, #tpu.memory_space<vmem>>, vector<8x32xf32>
    %1 = arith.truncf %0 : vector<8x32xf32> to vector<8x32xbf16>
    %c0_1 = arith.constant 0 : index
    %c0_2 = arith.constant 0 : index
    %2 = vector.load %arg2[%c0_1, %c0_2] : memref<32x128xbf16, #tpu.memory_space<vmem>>, vector<32x128xbf16>
    %cst = arith.constant dense<0.000000e+00> : vector<8x128xf32>
    %3 = tpu.matmul %1, %2, %cst {dimension_numbers = #tpu.dot_dimension_numbers<[1], [0], [0], [1], [0, 0, 1, 1], [], []>} : vector<8x32xbf16>, vector<32x128xbf16>, vector<8x128xf32> -> vector<8x128xf32>
    %c0_3 = arith.constant 0 : index
    %c0_4 = arith.constant 0 : index
    %4 = vector.load %arg3[%c0_3, %c0_4] : memref<1x128xf32, #tpu.memory_space<vmem>>, vector<1x128xf32>
    %5 = vector.broadcast %4 : vector<1x128xf32> to vector<8x128xf32>
    %6 = arith.addf %3, %5 : vector<8x128xf32>
    %cst_5 = arith.constant 0.000000e+00 : f32
    %7 = vector.broadcast %cst_5 : f32 to vector<8x128xf32>
    %8 = arith.maximumf %6, %7 : vector<8x128xf32>
    %9 = arith.truncf %8 : vector<8x128xf32> to vector<8x128xbf16>
    %c0_6 = arith.constant 0 : index
    %c0_7 = arith.constant 0 : index
    %10 = vector.load %arg4[%c0_6, %c0_7] : memref<128x128xbf16, #tpu.memory_space<vmem>>, vector<128x128xbf16>
    %cst_8 = arith.constant dense<0.000000e+00> : vector<8x128xf32>
    %11 = tpu.matmul %9, %10, %cst_8 {dimension_numbers = #tpu.dot_dimension_numbers<[1], [0], [0], [1], [0, 0, 1, 1], [], []>} : vector<8x128xbf16>, vector<128x128xbf16>, vector<8x128xf32> -> vector<8x128xf32>
    %c0_9 = arith.constant 0 : index
    %c0_10 = arith.constant 0 : index
    %12 = vector.load %arg5[%c0_9, %c0_10] : memref<1x128xf32, #tpu.memory_space<vmem>>, vector<1x128xf32>
    %13 = vector.broadcast %12 : vector<1x128xf32> to vector<8x128xf32>
    %14 = arith.addf %11, %13 : vector<8x128xf32>
    %c0_11 = arith.constant 0 : index
    %c0_12 = arith.constant 0 : index
    %15 = vector.load %arg6[%c0_11, %c0_12] : memref<8x128xf32, #tpu.memory_space<vmem>>, vector<8x128xf32>
    tpu.vector_store %arg6[%c0_11, %c0_12], %14 {strides = array<i32>} : memref<8x128xf32, #tpu.memory_space<vmem>>, vector<8x128xf32>,
    return
  }
  func.func @transform_0(%arg0: i32) -> (i32, i32) {
    %c0_i32 = arith.constant 0 : i32
    %c0_i32_0 = arith.constant 0 : i32
    return %arg0, %c0_i32 : i32, i32
  }
  func.func @transform_1(%arg0: i32) -> (i32, i32) {
    %c0_i32 = arith.constant 0 : i32
    %c0_i32_0 = arith.constant 0 : i32
    %c0_i32_1 = arith.constant 0 : i32
    return %c0_i32, %c0_i32_0 : i32, i32
  }
  func.func @transform_2(%arg0: i32) -> (i32, i32) {
    %c0_i32 = arith.constant 0 : i32
    %c0_i32_0 = arith.constant 0 : i32
    %c0_i32_1 = arith.constant 0 : i32
    return %c0_i32, %c0_i32_0 : i32, i32
  }
  func.func @transform_3(%arg0: i32) -> (i32, i32) {
    %c0_i32 = arith.constant 0 : i32
    %c0_i32_0 = arith.constant 0 : i32
    %c0_i32_1 = arith.constant 0 : i32
    return %c0_i32, %c0_i32_0 : i32, i32
  }
  func.func @transform_4(%arg0: i32) -> (i32, i32) {
    %c0_i32 = arith.constant 0 : i32
    %c0_i32_0 = arith.constant 0 : i32
    %c0_i32_1 = arith.constant 0 : i32
    return %c0_i32, %c0_i32_0 : i32, i32
  }
  func.func @transform_5(%arg0: i32) -> (i32, i32) {
    %c0_i32 = arith.constant 0 : i32
    %c0_i32_0 = arith.constant 0 : i32
    return %arg0, %c0_i32 : i32, i32
  }
}

</mosaic_0001>

<bundles_post_ra>
// kernel: tpu_custom_call.1
= control target key start
LH: loop header
LB: loop body
LE: loop exit
PB: predicated region body
PF: predicated region fallthrough
CT: control target
= control target key end

     0   :  { %10 = vsyncpa [#allocation3], 0  ;;  %s423_s0 = inlined_call_operand.hbm [shape: f32[8,32], index: 0, kind: input, shape index: {}]   ;;  %s424_s1 = inlined_call_operand.hbm [shape: bf16[32,128], index: 1, kind: input, shape index: {}]   ;;  %s425_s2 = inlined_call_operand.vmem [shape: f32[1,128], index: 2, kind: input, shape index: {}]   ;;  %s426_s3 = inlined_call_operand.hbm [shape: bf16[128,128], index: 3, kind: input, shape index: {}]   ;;  %s427_s4 = inlined_call_operand.vmem [shape: f32[1,128], index: 4, kind: input, shape index: {}]   ;;  %s428_s5 = inlined_call_operand.hbm [shape: f32[8,128], index: 5, kind: output, shape index: {}]  }
   0x1   :  { %11 = vsyncpa [#allocation6], 0  ;;  %s28_s20 = sshll.u32 %s424_s1, 4  ;;  %s29_s20 = int_to_ptr.hbm [resolvable:$true] %s28_s20 }
   0x2   :  { %12 = vsyncpa [#allocation4], 0  ;;  %s369_s21 = smov [#allocation5]   ;;  %s18_s25 = sshll.u32 %s423_s0, 4  ;;  %s19_s25 = int_to_ptr.hbm [resolvable:$true] %s18_s25 }
   0x3   :  { %s30_s22 = sshll.u32 %s369_s21, 4  ;;  %s370_s26 = smov 64   ;;  %s31_s22 = int_to_ptr.vmem [resolvable:$true] %s30_s22 }
   0x4   :  { %s371_s27 = smov 4   ;;  %s372_s28 = smov [#allocation2]  }
   0x5   :  { %36 = dma.hbm_to_vmem [thread:$0]  %s29_s20, 256, %s31_s22, [#allocation6], %s370_s26, %s370_s26, %s371_s27  }
   0x6   :  { %s20_s29 = sshll.u32 %s372_s28, 4  ;;  %s43_s7 = sshll.u32 %s426_s3, 4  ;;  %s21_s29 = int_to_ptr.vmem [resolvable:$true] %s20_s29  ;;  %s44_s7 = int_to_ptr.hbm [resolvable:$true] %s43_s7 }
   0x7   :  { %23 = dma.hbm_to_vmem [thread:$0]  %s19_s25, 128, %s21_s29, [#allocation3]  }
   0x8   :  { %s373_s1 = smov [#allocation7]  }
   0x9   :  { %s45_s8 = sshll.u32 %s373_s1, 4  ;;  %s46_s8 = int_to_ptr.vmem [resolvable:$true] %s45_s8 }
   0xa   :  { %51 = dma.hbm_to_vmem [thread:$0]  %s44_s7, 1024, %s46_s8, [#allocation6], %s370_s26, %s370_s26, %s371_s27  }
   0xb   :  { %363 = dma.done.wait [#allocation3], 128  }
   0xc   :  { %364 = vsyncadd [#allocation3], 4294967168 }
   0xd   :  { %365 = dma.done.wait [#allocation6], 1280  }
   0xe   :  { %366 = vsyncadd [#allocation6], 4294966016  ;;  %v250_v0 = vld [vmem:[#allocation5 + $0x8] sm:$0xff]  ;;  %v249_v2 = vld [vmem:[#allocation5] sm:$0xff]  ;;  %vm89_vm0 = vcmask 261120   ;;  %s374_s11 = smov [#allocation8]  }
   0xf   :  { %v258_v1 = vld [vmem:[#allocation7 + $0x38] sm:$0xff]  ;;  %99 = vmatpush.bf16.msra.mxu0 %v250_v0  ;;  %v67_v3 = vld [vmem:[#allocation2] sm:$0xff]  ;;  %v257_v4 = vld [vmem:[#allocation7 + $0x30] sm:$0xff]  ;;  %s195_s12 = sshll.u32 %s374_s11, 4  ;;  %s197_s15 = sshll.u32 %s428_s5, 4  ;;  %s196_s12 = int_to_ptr.vmem [resolvable:$true] %s195_s12  ;;  %s198_s15 = int_to_ptr.hbm [resolvable:$true] %s197_s15 }
  0x10   :  { %176 = vmatpush.bf16.msra.mxu1 %v258_v1  ;;  %v68_v5 = vpack.c.bf16 %v67_v3, %v67_v3  ;;  %v256_v6 = vld [vmem:[#allocation7 + $0x28] sm:$0xff]  ;;  %v255_v7 = vld [vmem:[#allocation7 + $0x20] sm:$0xff]  ;;  %v254_v8 = vld [vmem:[#allocation7 + $0x18] sm:$0xff] }
  0x11   :  { %v253_v9 = vld [vmem:[#allocation7 + $0x10] sm:$0xff]  ;;  %v252_v10 = vld [vmem:[#allocation7 + $0x8] sm:$0xff]  ;;  %v251_v11 = vld [vmem:[#allocation7] sm:$0xff] }
  0x12   :  { %v265_v12 = vld [vmem:[%s425_s2] ss:$0 sm:$0xff] }
  0x13   :  { %100 = vmatpush.bf16.msra.mxu0 %v249_v2  ;;  %v266_v18 = vld [vmem:[%s427_s4] ss:$0 sm:$0xff] }
  0x14   :  { %177 = vmatpush.bf16.msra.mxu1 %v257_v4 }
  0x16   :  { %216 = vmatmul.msk.bf16.vlgmr.msra.gmra.mxu0 %vm89_vm0, %v68_v5 }
  0x18   :  { %178 = vmatpush.bf16.msra.mxu1 %v256_v6 }
  0x1c   :  { %179 = vmatpush.bf16.msra.mxu1 %v255_v7 }
  0x20   :  { %180 = vmatpush.bf16.msra.mxu1 %v254_v8 }
  0x24   :  { %181 = vmatpush.bf16.msra.mxu1 %v253_v9 }
  0x28   :  { %182 = vmatpush.bf16.msra.mxu1 %v252_v10 }
  0x2c   :  { %183 = vmatpush.bf16.msra.mxu1 %v251_v11 }
  0x93   :  { %v102_v13 = vpop.f32.mrf.mxu0 }
  0x94   :  { %v103_v14 = vadd.f32 %v265_v12, %v102_v13 }
  0x96   :  { %v106_v15 = vmax.f32 %v103_v14, 0.0 }
  0x98   :  { %v107_v16 = vpack.c.bf16 %v106_v15, %v106_v15 }
  0x9a   :  { %184 = vmatmul.bf16.vlgmr.msra.gmra.mxu1 %v107_v16 }
  0x9b   :  { %v104_v17 = vpop.f32.mrf.mxu0 }
 0x117   :  { %v185_v19 = vpop.f32.mrf.mxu1 }
 0x118   :  { %v186_v20 = vadd.f32 %v266_v18, %v185_v19 }
 0x11a   :  { %189 = vst [vmem:[#allocation8] sm:$0xff] %v186_v20 }
 0x11b   :  { %200 = dma.vmem_to_hbm [thread:$0]  %s196_s12, 128, %s198_s15, [#allocation4]  }
 0x11f   :  { %v187_v21 = vpop.f32.mrf.mxu1 }
 0x120   :  { %367 = dma.done.wait [#allocation4], 128  }
 0x121   :  { %368 = vsyncadd [#allocation4], 4294967168 }
 0x122   :  { %205 = vsyncpa [#allocation3], 1 }
 0x123   :  { %206 = vsyncpa [#allocation6], 1 }
 0x124   :  { %207 = vsyncpa [#allocation4], 1 }

</bundles_post_ra>
